<compile_context>
chip_gen: v5e
topology: v5e:2x2
jax: 0.10.0
libtpu: 0.0.40
codegen_flags: <defaults>
</compile_context>

<pallas_src>
import jax
import jax.numpy as jnp
from jax.experimental import pallas as pl
from jax.experimental.pallas import tpu as pltpu


def _encoder_kernel(x_ref, w1_ref, b1_ref, w2_ref, b2_ref, o_ref):
    # fc1 + ReLU (f32 accumulation on the MXU, bias add + max on the VPU).
    h = jnp.dot(x_ref[...], w1_ref[...], preferred_element_type=jnp.float32)
    h = jnp.maximum(h + b1_ref[...].astype(jnp.float32), 0.0)
    # TODO(synk): dropout(p=0.2) is identity at inference; training-mode RNG mask not implemented.
    # fc2 + ReLU.
    h = h.astype(w2_ref.dtype)
    out = jnp.dot(h, w2_ref[...], preferred_element_type=jnp.float32)
    out = jnp.maximum(out + b2_ref[...].astype(jnp.float32), 0.0)
    o_ref[...] = out.astype(o_ref.dtype)


def _choose_block_b(B, D, itemsize, row_align, max_block_rows, vmem_budget):
    """Largest single batch tile that fits the row cap and a per-buffer VMEM
    budget.  A single full-extent tile needs no alignment and is best on
    single-TensorCore chips (v5e/v6e); only very large batches get tiled."""
    rows_by_vmem = max(row_align, vmem_budget // max(1, D * itemsize))
    cap = min(max_block_rows, rows_by_vmem)
    cap = max(row_align, (cap // row_align) * row_align)
    if B <= cap:
        return B                      # single full-extent tile, grid == 1
    return cap                        # aligned tile, grid > 1


def sigma_profile_encoder(x, w1, b1, w2, b2, *, block_b=None, out_dtype=None,
                          max_block_rows=8192,
                          vmem_bytes_per_x_buffer=4 * 1024 * 1024,
                          xla_fallback_rows=None):
    """x: [B, D]; w1: [D, 2H]; b1: [2H]; w2: [2H, H]; b2: [H] -> [B, H].

    Inputs are streamed in whatever dtype the caller supplies (pass bf16 to
    halve HBM traffic); accumulation is always f32 on the MXU.  On v7x
    (2 TensorCores) pass block_b <= B//2 (multiple of the row alignment) so
    the 'parallel' batch axis has >=2 grid steps to shard across cores.
    """
    B, D = x.shape
    D_w, H2 = w1.shape
    H2_w, H = w2.shape
    assert D_w == D and H2_w == H2, "weight shapes inconsistent with x"
    if out_dtype is None:
        out_dtype = x.dtype

    # Optional tiny-batch escape hatch: below this size the pallas_call launch
    # overhead exceeds an XLA-fused dot+relu chain.  Disabled by default.
    if xla_fallback_rows is not None and B <= xla_fallback_rows:
        h = jnp.maximum(x @ w1 + b1, 0.0)
        return jnp.maximum(h @ w2 + b2, 0.0).astype(out_dtype)

    itemsize = jnp.dtype(x.dtype).itemsize
    row_align = max(8, 32 // itemsize)      # 8 (f32), 16 (bf16), 32 (int8/fp8)

    if block_b is None:
        block_b = _choose_block_b(B, D, itemsize, row_align,
                                  max_block_rows, vmem_bytes_per_x_buffer)
    block_b = int(min(block_b, B))
    if block_b != B and block_b % row_align != 0:
        raise ValueError(
            f"block_b={block_b} must be a multiple of {row_align} for "
            f"dtype {x.dtype} when tiling the batch axis")

    grid_n = pl.cdiv(B, block_b)
    B_pad = grid_n * block_b
    xk = x
    if B_pad != B:
        # Rare corner case: large batch not divisible by the tile.  One extra
        # pass over x; padded rows are sliced off below.
        # TODO(synk): mask the boundary block in-kernel to avoid this pass.
        xk = jnp.pad(x, ((0, B_pad - B), (0, 0)))

    b1_2d = b1.reshape(1, H2)
    b2_2d = b2.reshape(1, H)

    cost = pl.CostEstimate(
        flops=2 * B_pad * (D * H2 + H2 * H),
        transcendentals=0,
        bytes_accessed=int(
            B_pad * D * itemsize                                  # x read
            + D * H2 * jnp.dtype(w1.dtype).itemsize               # W1
            + H2 * H * jnp.dtype(w2.dtype).itemsize               # W2
            + H2 * jnp.dtype(b1.dtype).itemsize                   # b1
            + H * jnp.dtype(b2.dtype).itemsize                    # b2
            + B_pad * H * jnp.dtype(out_dtype).itemsize),         # output
    )

    out = pl.pallas_call(
        _encoder_kernel,
        out_shape=jax.ShapeDtypeStruct((B_pad, H), out_dtype),
        grid_spec=pltpu.PrefetchScalarGridSpec(
            num_scalar_prefetch=0,
            grid=(grid_n,),
            in_specs=[
                pl.BlockSpec((block_b, D), lambda i: (i, 0)),   # x tile (streamed)
                pl.BlockSpec((D, H2), lambda i: (0, 0)),        # W1 (resident)
                pl.BlockSpec((1, H2), lambda i: (0, 0)),        # b1 (resident)
                pl.BlockSpec((H2, H), lambda i: (0, 0)),        # W2 (resident)
                pl.BlockSpec((1, H), lambda i: (0, 0)),         # b2 (resident)
            ],
            out_specs=pl.BlockSpec((block_b, H), lambda i: (i, 0)),
        ),
        compiler_params=pltpu.CompilerParams(
            dimension_semantics=("parallel",),
        ),
        cost_estimate=cost,
    )(xk, w1, b1_2d, w2, b2_2d)

    return out[:B] if B_pad != B else out


def _reference(x, w1, b1, w2, b2):
    h = jnp.maximum(x @ w1 + b1, 0.0)
    return jnp.maximum(h @ w2 + b2, 0.0)


if __name__ == "__main__":
    # Small shapes consistent with the module: batch=8, input_dim=64, hidden_dim=32.
    B, D, H = 8, 64, 32
    H2 = 2 * H

    key = jax.random.PRNGKey(0)
    kx, kw1, kb1, kw2, kb2 = jax.random.split(key, 5)

    x = jax.random.normal(kx, (B, D), dtype=jnp.float32)
    # PyTorch Linear-style uniform init bounds.
    bound1 = 1.0 / (D ** 0.5)
    w1 = jax.random.uniform(kw1, (D, H2), minval=-bound1, maxval=bound1, dtype=jnp.float32)
    b1 = jax.random.uniform(kb1, (H2,), minval=-bound1, maxval=bound1, dtype=jnp.float32)
    bound2 = 1.0 / (H2 ** 0.5)
    w2 = jax.random.uniform(kw2, (H2, H), minval=-bound2, maxval=bound2, dtype=jnp.float32)
    b2 = jax.random.uniform(kb2, (H,), minval=-bound2, maxval=bound2, dtype=jnp.float32)

    ref = _reference(x, w1, b1, w2, b2)

    # 1) f32, single full-extent tile: exact check of the fused kernel math.
    out_f32 = jax.block_until_ready(sigma_profile_encoder(x, w1, b1, w2, b2))
    assert out_f32.shape == (B, H) and out_f32.dtype == jnp.float32
    assert jnp.allclose(out_f32, ref, atol=1e-5, rtol=1e-5), "f32 mismatch vs reference"

    # 2) Producer-supplied bf16 operands (halves the dominant HBM streams and
    #    the narrow-output writeback); accumulation stays f32 on the MXU.
    out_bf16 = jax.block_until_ready(
        sigma_profile_encoder(x.astype(jnp.bfloat16), w1.astype(jnp.bfloat16),
                              b1, w2.astype(jnp.bfloat16), b2))
    assert out_bf16.shape == (B, H) and out_bf16.dtype == jnp.bfloat16
    assert jnp.allclose(out_bf16.astype(jnp.float32), ref, atol=5e-2, rtol=5e-2), \
        "bf16 mismatch vs reference"

    # 3) Tiled batch (grid > 1 via explicit block_b), including a batch that
    #    is not a multiple of the tile (padded corner case, then sliced).
    for B2, bb in ((48, 16), (40, 16)):
        x2 = jax.random.normal(jax.random.PRNGKey(1), (B2, D), dtype=jnp.float32)
        out2 = jax.block_until_ready(
            sigma_profile_encoder(x2, w1, b1, w2, b2, block_b=bb))
        ref2 = _reference(x2, w1, b1, w2, b2)
        assert out2.shape == (B2, H)
        assert jnp.allclose(out2, ref2, atol=1e-5, rtol=1e-5), \
            f"tiled mismatch vs reference (B={B2}, block_b={bb})"

    print("KERNEL_OK")
</pallas_src>

<mosaic_0001>
module attributes {stable_mosaic.version = 11 : i64} {
  func.func @_encoder_kernel(%arg0: i32, %arg1: memref<8x64xf32, #tpu.memory_space<vmem>>, %arg2: memref<64x64xf32, #tpu.memory_space<vmem>>, %arg3: memref<1x64xf32, #tpu.memory_space<vmem>>, %arg4: memref<64x32xf32, #tpu.memory_space<vmem>>, %arg5: memref<1x32xf32, #tpu.memory_space<vmem>>, %arg6: memref<8x32xf32, #tpu.memory_space<vmem>>) attributes {dimension_semantics = [#tpu.dimension_semantics<parallel>], iteration_bounds = array<i64: 1>, scalar_prefetch = 0 : i64, scratch_operands = 0 : i64, tpu.core_type = #tpu.core_type<tc>, window_params = [{transform_indices = @transform_0, window_bounds = array<i64: 8, 64>}, {pipeline_mode = #tpu.pipeline_mode<synchronous>, transform_indices = @transform_1, window_bounds = array<i64: 64, 64>}, {pipeline_mode = #tpu.pipeline_mode<synchronous>, transform_indices = @transform_2, window_bounds = array<i64: 1, 64>}, {pipeline_mode = #tpu.pipeline_mode<synchronous>, transform_indices = @transform_3, window_bounds = array<i64: 64, 32>}, {pipeline_mode = #tpu.pipeline_mode<synchronous>, transform_indices = @transform_4, window_bounds = array<i64: 1, 32>}, {transform_indices = @transform_5, window_bounds = array<i64: 8, 32>}]} {
    %c0 = arith.constant 0 : index
    %c0_0 = arith.constant 0 : index
    %0 = vector.load %arg1[%c0, %c0_0] : memref<8x64xf32, #tpu.memory_space<vmem>>, vector<8x64xf32>
    %c0_1 = arith.constant 0 : index
    %c0_2 = arith.constant 0 : index
    %1 = vector.load %arg2[%c0_1, %c0_2] : memref<64x64xf32, #tpu.memory_space<vmem>>, vector<64x64xf32>
    %cst = arith.constant dense<0.000000e+00> : vector<8x64xf32>
    %2 = tpu.matmul %0, %1, %cst {dimension_numbers = #tpu.dot_dimension_numbers<[1], [0], [0], [1], [0, 0, 1, 1], [], []>} : vector<8x64xf32>, vector<64x64xf32>, vector<8x64xf32> -> vector<8x64xf32>
    %c0_3 = arith.constant 0 : index
    %c0_4 = arith.constant 0 : index
    %3 = vector.load %arg3[%c0_3, %c0_4] : memref<1x64xf32, #tpu.memory_space<vmem>>, vector<1x64xf32>
    %4 = vector.broadcast %3 : vector<1x64xf32> to vector<8x64xf32>
    %5 = arith.addf %2, %4 : vector<8x64xf32>
    %cst_5 = arith.constant 0.000000e+00 : f32
    %6 = vector.broadcast %cst_5 : f32 to vector<8x64xf32>
    %7 = arith.maximumf %5, %6 : vector<8x64xf32>
    %c0_6 = arith.constant 0 : index
    %c0_7 = arith.constant 0 : index
    %8 = vector.load %arg4[%c0_6, %c0_7] : memref<64x32xf32, #tpu.memory_space<vmem>>, vector<64x32xf32>
    %cst_8 = arith.constant dense<0.000000e+00> : vector<8x32xf32>
    %9 = tpu.matmul %7, %8, %cst_8 {dimension_numbers = #tpu.dot_dimension_numbers<[1], [0], [0], [1], [0, 0, 1, 1], [], []>} : vector<8x64xf32>, vector<64x32xf32>, vector<8x32xf32> -> vector<8x32xf32>
    %c0_9 = arith.constant 0 : index
    %c0_10 = arith.constant 0 : index
    %10 = vector.load %arg5[%c0_9, %c0_10] : memref<1x32xf32, #tpu.memory_space<vmem>>, vector<1x32xf32>
    %11 = vector.broadcast %10 : vector<1x32xf32> to vector<8x32xf32>
    %12 = arith.addf %9, %11 : vector<8x32xf32>
    %cst_11 = arith.constant 0.000000e+00 : f32
    %13 = vector.broadcast %cst_11 : f32 to vector<8x32xf32>
    %14 = arith.maximumf %12, %13 : vector<8x32xf32>
    %c0_12 = arith.constant 0 : index
    %c0_13 = arith.constant 0 : index
    %15 = vector.load %arg6[%c0_12, %c0_13] : memref<8x32xf32, #tpu.memory_space<vmem>>, vector<8x32xf32>
    tpu.vector_store %arg6[%c0_12, %c0_13], %14 {strides = array<i32>} : memref<8x32xf32, #tpu.memory_space<vmem>>, vector<8x32xf32>,
    return
  }
  func.func @transform_0(%arg0: i32) -> (i32, i32) {
    %c0_i32 = arith.constant 0 : i32
    %c0_i32_0 = arith.constant 0 : i32
    return %arg0, %c0_i32 : i32, i32
  }
  func.func @transform_1(%arg0: i32) -> (i32, i32) {
    %c0_i32 = arith.constant 0 : i32
    %c0_i32_0 = arith.constant 0 : i32
    %c0_i32_1 = arith.constant 0 : i32
    return %c0_i32, %c0_i32_0 : i32, i32
  }
  func.func @transform_2(%arg0: i32) -> (i32, i32) {
    %c0_i32 = arith.constant 0 : i32
    %c0_i32_0 = arith.constant 0 : i32
    %c0_i32_1 = arith.constant 0 : i32
    return %c0_i32, %c0_i32_0 : i32, i32
  }
  func.func @transform_3(%arg0: i32) -> (i32, i32) {
    %c0_i32 = arith.constant 0 : i32
    %c0_i32_0 = arith.constant 0 : i32
    %c0_i32_1 = arith.constant 0 : i32
    return %c0_i32, %c0_i32_0 : i32, i32
  }
  func.func @transform_4(%arg0: i32) -> (i32, i32) {
    %c0_i32 = arith.constant 0 : i32
    %c0_i32_0 = arith.constant 0 : i32
    %c0_i32_1 = arith.constant 0 : i32
    return %c0_i32, %c0_i32_0 : i32, i32
  }
  func.func @transform_5(%arg0: i32) -> (i32, i32) {
    %c0_i32 = arith.constant 0 : i32
    %c0_i32_0 = arith.constant 0 : i32
    return %arg0, %c0_i32 : i32, i32
  }
}

</mosaic_0001>

<bundles_post_ra>
// kernel: tpu_custom_call.1
= control target key start
LH: loop header
LB: loop body
LE: loop exit
PB: predicated region body
PF: predicated region fallthrough
CT: control target
= control target key end

     0   :  { %s235_s0 = inlined_call_operand.vmem [shape: f32[8,64], index: 0, kind: input, shape index: {}]   ;;  %s236_s1 = inlined_call_operand.vmem [shape: f32[64,64], index: 1, kind: input, shape index: {}]   ;;  %s237_s2 = inlined_call_operand.vmem [shape: f32[1,64], index: 2, kind: input, shape index: {}]   ;;  %s238_s3 = inlined_call_operand.vmem [shape: f32[64,32], index: 3, kind: input, shape index: {}]   ;;  %s239_s4 = inlined_call_operand.vmem [shape: f32[1,32], index: 4, kind: input, shape index: {}]   ;;  %s240_s5 = inlined_call_operand.hbm [shape: f32[8,32], index: 5, kind: output, shape index: {}]  }
   0x1   :  { %v29_v0 = vld [vmem:[%s236_s1 + $0x38] sm:$0xff]  ;;  %v28_v1 = vld [vmem:[%s236_s1 + $0x30] sm:$0xff]  ;;  %v27_v2 = vld [vmem:[%s236_s1 + $0x28] sm:$0xff] }
   0x2   :  { %46 = vmatpush.msra.mxu0 %v29_v0  ;;  %v66_v3 = vld [vmem:[%s238_s3 + $0x38] sm:$0xff]  ;;  %v65_v4 = vld [vmem:[%s238_s3 + $0x30] sm:$0xff]  ;;  %v26_v5 = vld [vmem:[%s236_s1 + $0x20] sm:$0xff] }
   0x3   :  { %82 = vmatpush.msra.mxu1 %v66_v3  ;;  %v64_v6 = vld [vmem:[%s238_s3 + $0x28] sm:$0xff] }
   0x4   :  { %47 = vmatpush.msra.mxu0 %v28_v1 }
   0x6   :  { %48 = vmatpush.msra.mxu0 %v27_v2 }
   0x7   :  { %10 = vsyncpa [#allocation3], 0  ;;  %v25_v7 = vld [vmem:[%s236_s1 + $0x18] sm:$0xff]  ;;  %83 = vmatpush.msra.mxu1 %v65_v4  ;;  %v63_v8 = vld [vmem:[%s238_s3 + $0x20] sm:$0xff]  ;;  %vm34_vm0 = vcmask 523264   ;;  %s144_s29 = smov [#allocation2]  }
   0x8   :  { %49 = vmatpush.msra.mxu0 %v26_v5  ;;  %v24_v9 = vld [vmem:[%s236_s1 + $0x10] sm:$0xff]  ;;  %v62_v10 = vld [vmem:[%s238_s3 + $0x18] sm:$0xff]  ;;  %v23_v11 = vld [vmem:[%s236_s1 + $0x8] sm:$0xff]  ;;  %s102_s30 = sshll.u32 %s144_s29, 4  ;;  %vm95_vm1 = vcmask 261120   ;;  %s103_s30 = int_to_ptr.vmem [resolvable:$true] %s102_s30 }
   0x9   :  { %84 = vmatpush.msra.mxu1 %v64_v6  ;;  %v22_v12 = vld [vmem:[%s236_s1] sm:$0xff]  ;;  %v61_v14 = vld [vmem:[%s238_s3 + $0x10] sm:$0xff]  ;;  %v60_v15 = vld [vmem:[%s238_s3 + $0x8] sm:$0xff] }
   0xa   :  { %50 = vmatpush.msra.mxu0 %v25_v7  ;;  %v21_v13 = vld [vmem:[%s235_s0] sm:$0xff] }
   0xb   :  { %85 = vmatpush.msra.mxu1 %v63_v8  ;;  %v59_v16 = vld [vmem:[%s238_s3] sm:$0xff]  ;;  %s104_s3 = sshll.u32 %s240_s5, 4  ;;  %s105_s3 = int_to_ptr.hbm [resolvable:$true] %s104_s3 }
   0xc   :  { %51 = vmatpush.msra.mxu0 %v24_v9  ;;  %v116_v17 = vld [vmem:[%s237_s2] ss:$0 sm:$0xff] }
   0xd   :  { %86 = vmatpush.msra.mxu1 %v62_v10  ;;  %v117_v21 = vld [vmem:[%s239_s4] ss:$0 sm:$0xff] }
   0xe   :  { %52 = vmatpush.msra.mxu0 %v23_v11 }
   0xf   :  { %87 = vmatpush.msra.mxu1 %v61_v14 }
  0x10   :  { %53 = vmatpush.msra.mxu0 %v22_v12 }
  0x11   :  { %113 = vmatmul.msk.f32.vlgmr.msra.gmra.mxu0 %vm34_vm0, %v21_v13  ;;  %88 = vmatpush.msra.mxu1 %v60_v15 }
  0x13   :  { %89 = vmatpush.msra.mxu1 %v59_v16 }
  0x8e   :  { %v55_v18 = vpop.f32.mrf.mxu0 }
  0x8f   :  { %v56_v19 = vadd.f32 %v116_v17, %v55_v18 }
  0x91   :  { %v58_v20 = vmax.f32 %v56_v19, 0.0 }
  0x93   :  { %114 = vmatmul.msk.f32.vlgmr.msra.gmra.mxu1 %vm34_vm0, %v58_v20 }
 0x110   :  { %v91_v22 = vpop.f32.mrf.mxu1 }
 0x111   :  { %v92_v23 = vadd.f32 %v117_v21, %v91_v22 }
 0x113   :  { %v94_v24 = vmax.f32 %v92_v23, 0.0 }
 0x115   :  { %96 = vst.msk [vmem:[#allocation2] sm:$0xff] %vm95_vm1, %v94_v24 }
 0x116   :  { %107 = dma.vmem_to_hbm [thread:$0]  %s103_s30, 128, %s105_s3, [#allocation3]  }
 0x117   :  { %142 = dma.done.wait [#allocation3], 128  }
 0x118   :  { %143 = vsyncadd [#allocation3], 4294967168 }
 0x119   :  { %112 = vsyncpa [#allocation3], 1 }

</bundles_post_ra>
